<compile_context>
chip_gen: v5e
topology: v5e:2x2
jax: 0.10.0
libtpu: 0.0.40
codegen_flags: <defaults>
</compile_context>

<pallas_src>
import functools

import jax
import jax.numpy as jnp
import numpy as np
from jax.experimental import pallas as pl
from jax.experimental.pallas import tpu as pltpu


# ---------------------------------------------------------------------------
# Helpers
# ---------------------------------------------------------------------------
def _lane_perm(width, f):
    """One-hot (width, width): output lane fw*(width//f)+wo <- input lane wo*f+fw."""
    wq = width // f
    k = np.arange(width)
    src = (k % wq) * f + (k // wq)
    m = np.zeros((width, width), np.float32)
    m[src, k] = 1.0
    return m


def _vmem_budget():
    """(per-step tile budget bytes, vmem_limit_bytes), generation-aware."""
    cap = None
    try:
        cap = getattr(pltpu.get_tpu_info(), "vmem_capacity_bytes", None)
    except Exception:
        cap = None
    if cap is None:
        cap = 64 * 2**20                       # assume the smallest (v7x)
    if cap >= 96 * 2**20:                      # v5e / v6e: 128 MiB physical VMEM
        return 8 * 2**20, 64 * 2**20
    return 5 * 2**20, 36 * 2**20               # v7x: 64 MiB physical VMEM


def _largest_divisor(n, limit, multiple_of=1):
    limit = min(n, max(1, limit))
    for d in range(limit, 0, -1):
        if n % d == 0 and d % multiple_of == 0:
            return d
    return None


def _pick_blocks(n, rows, per_n_bytes, per_row_bytes, target):
    """Block of the leading (batch*channel) axis and of the row axis."""
    rblk = _largest_divisor(n, max(1, target // max(1, per_n_bytes)))
    hblk = rows
    if rblk == 1 and per_n_bytes > target:
        # Very large single image: tile the row axis (multiples of 8 sublanes).
        hblk = _largest_divisor(rows, max(1, target // max(1, per_row_bytes)),
                                multiple_of=8) or rows
    if rblk == n and n > 1 and hblk == rows:
        # Keep >= 2 grid steps on a parallel axis (megacore / v7x dual-TC).
        rblk = _largest_divisor(n, max(1, n // 2)) or 1
    return rblk, hblk


# ---------------------------------------------------------------------------
# Kernels
# ---------------------------------------------------------------------------
def _squeeze_kernel(x_ref, p_ref, o_ref, *, factor):
    # x_ref: (rblk, hblk, f*W)  -- lane index = fh*W + w  (rows are ho)
    # p_ref: (W, W)             -- one-hot: lane fw*Wo+wo <- lane wo*f+fw
    # o_ref: (rblk, f*f, hblk, Wo)
    f = factor
    rblk, hblk, fw_total = x_ref.shape
    W = fw_total // f
    Wo = W // f
    P = p_ref[...]
    for fh in range(f):
        rows = x_ref[:, :, fh * W:(fh + 1) * W]              # (rblk, hblk, W)
        flat = rows.reshape(rblk * hblk, W)                  # channels -> matmul M
        perm = jnp.dot(flat, P, preferred_element_type=jnp.float32)
        perm = perm.reshape(rblk, hblk, W).astype(o_ref.dtype)   # lanes = (fw, wo)
        for fw in range(f):
            p = fh * f + fw
            o_ref[:, p:p + 1, :, :] = (
                perm[:, :, fw * Wo:(fw + 1) * Wo].reshape(rblk, 1, hblk, Wo))


def _unsqueeze_kernel(x_ref, q_ref, o_ref, *, factor):
    # x_ref: (rblk, f*f, hblk, W)
    # q_ref: (f*W, f*W)          -- one-hot: lane w*f+fw <- lane fw*W+w
    # o_ref: (rblk, hblk, f*f*W) -- lane index = fh*Wf + (w*f+fw), Wf = f*W
    f = factor
    rblk, _, hblk, W = x_ref.shape
    Wf = f * W
    Q = q_ref[...]
    for fh in range(f):
        slabs = [x_ref[:, fh * f + fw:fh * f + fw + 1, :, :].reshape(rblk, hblk, W)
                 for fw in range(f)]
        a = jnp.concatenate(slabs, axis=-1)                  # lanes = (fw, w)
        flat = a.reshape(rblk * hblk, Wf)
        r = jnp.dot(flat, Q, preferred_element_type=jnp.float32)
        r = r.reshape(rblk, hblk, Wf).astype(o_ref.dtype)    # lanes = w*f+fw
        o_ref[:, :, fh * Wf:(fh + 1) * Wf] = r               # lane-dense store


# ---------------------------------------------------------------------------
# Wrappers
# ---------------------------------------------------------------------------
def squeeze2d_pallas(x, factor=2):
    assert factor >= 1 and isinstance(factor, int)
    if factor == 1:
        return x
    B, C, H, W = x.shape
    f = factor
    assert H % f == 0 and W % f == 0, f"{(H, W)}"
    f2 = f * f
    Ho, Wo = H // f, W // f

    if not jnp.issubdtype(x.dtype, jnp.floating):
        # TODO(synk): integer dtypes -> VPU-select path; use XLA reshuffle for now.
        return squeeze2d_ref(x, f)

    N = B * C
    xv = x.reshape(N, Ho, f * W)                 # free contiguous view
    P = jnp.asarray(_lane_perm(W, f), dtype=x.dtype)

    isz = x.dtype.itemsize
    target, vmem_limit = _vmem_budget()
    rblk, hblk = _pick_blocks(N, Ho, 2 * H * W * isz, 2 * f * W * isz, target)
    grid = (N // rblk, Ho // hblk)

    out = pl.pallas_call(
        functools.partial(_squeeze_kernel, factor=f),
        out_shape=jax.ShapeDtypeStruct((N, f2, Ho, Wo), x.dtype),
        grid=grid,
        in_specs=[
            pl.BlockSpec((rblk, hblk, f * W), lambda g, hi: (g, hi, 0)),
            pl.BlockSpec((W, W), lambda g, hi: (0, 0)),      # resident permutation
        ],
        out_specs=pl.BlockSpec((rblk, f2, hblk, Wo), lambda g, hi: (g, 0, hi, 0)),
        compiler_params=pltpu.CompilerParams(
            dimension_semantics=("parallel", "parallel"),
            vmem_limit_bytes=vmem_limit),
        cost_estimate=pl.CostEstimate(
            flops=2 * N * H * W * W, transcendentals=0,
            bytes_accessed=2 * x.size * isz),
    )(xv, P)
    return out.reshape(B, C * f2, Ho, Wo)        # free contiguous view


def unsqueeze2d_pallas(x, factor=2):
    assert factor >= 1 and isinstance(factor, int)
    if factor == 1:
        return x
    B, C, H, W = x.shape
    f = factor
    f2 = f * f
    assert C % f2 == 0, f"{C}"
    Cg = C // f2
    Hf, Wf = H * f, W * f

    if not jnp.issubdtype(x.dtype, jnp.floating):
        # TODO(synk): integer dtypes -> VPU-select path; use XLA reshuffle for now.
        return unsqueeze2d_ref(x, f)

    Ng = B * Cg
    xv = x.reshape(Ng, f2, H, W)                 # free contiguous view
    Q = jnp.asarray(_lane_perm(Wf, f).T, dtype=x.dtype)

    isz = x.dtype.itemsize
    target, vmem_limit = _vmem_budget()
    rblk, hblk = _pick_blocks(Ng, H, 2 * f2 * H * W * isz, 2 * f2 * W * isz, target)
    grid = (Ng // rblk, H // hblk)

    out = pl.pallas_call(
        functools.partial(_unsqueeze_kernel, factor=f),
        out_shape=jax.ShapeDtypeStruct((Ng, H, f * Wf), x.dtype),
        grid=grid,
        in_specs=[
            pl.BlockSpec((rblk, f2, hblk, W), lambda g, hi: (g, 0, hi, 0)),
            pl.BlockSpec((Wf, Wf), lambda g, hi: (0, 0)),    # resident permutation
        ],
        out_specs=pl.BlockSpec((rblk, hblk, f * Wf), lambda g, hi: (g, hi, 0)),
        compiler_params=pltpu.CompilerParams(
            dimension_semantics=("parallel", "parallel"),
            vmem_limit_bytes=vmem_limit),
        cost_estimate=pl.CostEstimate(
            flops=2 * Ng * f2 * H * W * Wf, transcendentals=0,
            bytes_accessed=2 * x.size * isz),
    )(xv, Q)
    return out.reshape(B, Cg, Hf, Wf)            # free contiguous view


class SqueezeLayer:
    """JAX/Pallas port of the PyTorch SqueezeLayer (no parameters)."""

    def __init__(self, factor):
        self.factor = factor

    def __call__(self, inp, logdet=None, reverse=False):
        if not reverse:
            return squeeze2d_pallas(inp, self.factor), logdet
        else:
            return unsqueeze2d_pallas(inp, self.factor), logdet


# ---------------------------------------------------------------------------
# Pure-JAX references (verification only)
# ---------------------------------------------------------------------------
def squeeze2d_ref(x, factor=2):
    if factor == 1:
        return x
    B, C, H, W = x.shape
    x = x.reshape(B, C, H // factor, factor, W // factor, factor)
    x = jnp.transpose(x, (0, 1, 3, 5, 2, 4))
    return x.reshape(B, C * factor * factor, H // factor, W // factor)


def unsqueeze2d_ref(x, factor=2):
    if factor == 1:
        return x
    f2 = factor ** 2
    B, C, H, W = x.shape
    x = x.reshape(B, C // f2, factor, factor, H, W)
    x = jnp.transpose(x, (0, 1, 4, 2, 5, 3))
    return x.reshape(B, C // f2, H * factor, W * factor)


if __name__ == "__main__":
    key = jax.random.PRNGKey(0)
    x = jax.random.normal(key, (2, 4, 16, 16), dtype=jnp.float32)
    layer = SqueezeLayer(factor=2)

    # Forward (squeeze).
    y, logdet = layer(x, logdet=None, reverse=False)
    y = jax.block_until_ready(y)
    assert y.shape == (2, 16, 8, 8)
    assert logdet is None
    np.testing.assert_allclose(np.asarray(y), np.asarray(squeeze2d_ref(x, 2)),
                               rtol=1e-6, atol=1e-6)

    # Reverse (unsqueeze) must invert the forward pass.
    x_rec, _ = layer(y, logdet=None, reverse=True)
    x_rec = jax.block_until_ready(x_rec)
    assert x_rec.shape == x.shape
    np.testing.assert_allclose(np.asarray(x_rec), np.asarray(x), rtol=1e-6, atol=1e-6)

    # Second shape: non-power-of-two channel count, larger spatial, grid > 1.
    x2 = jax.random.normal(jax.random.PRNGKey(0), (1, 3, 32, 32), dtype=jnp.float32)
    y2 = jax.block_until_ready(squeeze2d_pallas(x2, 2))
    np.testing.assert_allclose(np.asarray(y2), np.asarray(squeeze2d_ref(x2, 2)),
                               rtol=1e-6, atol=1e-6)
    x2r = jax.block_until_ready(unsqueeze2d_pallas(y2, 2))
    np.testing.assert_allclose(np.asarray(x2r), np.asarray(x2), rtol=1e-6, atol=1e-6)

    print("KERNEL_OK")
</pallas_src>

<mosaic_0001>
module attributes {stable_mosaic.version = 11 : i64} {
  func.func @_squeeze_kernel(%arg0: i32, %arg1: i32, %arg2: memref<4x8x32xf32, #tpu.memory_space<vmem>>, %arg3: memref<16x16xf32, #tpu.memory_space<vmem>>, %arg4: memref<4x4x8x8xf32, #tpu.memory_space<vmem>>) attributes {dimension_semantics = [#tpu.dimension_semantics<parallel>, #tpu.dimension_semantics<parallel>], iteration_bounds = array<i64: 2, 1>, scalar_prefetch = 0 : i64, scratch_operands = 0 : i64, tpu.core_type = #tpu.core_type<tc>, window_params = [{transform_indices = @transform_0, window_bounds = array<i64: 4, 8, 32>}, {pipeline_mode = #tpu.pipeline_mode<synchronous>, transform_indices = @transform_1, window_bounds = array<i64: 16, 16>}, {transform_indices = @transform_2, window_bounds = array<i64: 4, 4, 8, 8>}]} {
    %c0 = arith.constant 0 : index
    %c0_0 = arith.constant 0 : index
    %0 = vector.load %arg3[%c0, %c0_0] : memref<16x16xf32, #tpu.memory_space<vmem>>, vector<16x16xf32>
    %c0_1 = arith.constant 0 : index
    %c0_2 = arith.constant 0 : index
    %c0_3 = arith.constant 0 : index
    %1 = vector.load %arg2[%c0_1, %c0_2, %c0_3] : memref<4x8x32xf32, #tpu.memory_space<vmem>>, vector<4x8x16xf32>
    %2 = vector.shape_cast %1 : vector<4x8x16xf32> to vector<32x16xf32>
    %cst = arith.constant dense<0.000000e+00> : vector<32x16xf32>
    %3 = tpu.matmul %2, %0, %cst {dimension_numbers = #tpu.dot_dimension_numbers<[1], [0], [0], [1], [0, 0, 1, 1], [], []>} : vector<32x16xf32>, vector<16x16xf32>, vector<32x16xf32> -> vector<32x16xf32>
    %4 = vector.shape_cast %3 : vector<32x16xf32> to vector<4x8x16xf32>
    %5 = vector.extract_strided_slice %4 {offsets = [0, 0, 0], sizes = [4, 8, 8], strides = [1, 1, 1]} : vector<4x8x16xf32> to vector<4x8x8xf32>
    %6 = vector.shape_cast %5 : vector<4x8x8xf32> to vector<4x1x8x8xf32>
    %c0_4 = arith.constant 0 : index
    %c0_5 = arith.constant 0 : index
    %c0_6 = arith.constant 0 : index
    %c0_7 = arith.constant 0 : index
    %7 = vector.load %arg4[%c0_4, %c0_5, %c0_6, %c0_7] : memref<4x4x8x8xf32, #tpu.memory_space<vmem>>, vector<4x1x8x8xf32>
    tpu.vector_store %arg4[%c0_4, %c0_5, %c0_6, %c0_7], %6 {strides = array<i32>} : memref<4x4x8x8xf32, #tpu.memory_space<vmem>>, vector<4x1x8x8xf32>,
    %8 = vector.extract_strided_slice %4 {offsets = [0, 0, 8], sizes = [4, 8, 8], strides = [1, 1, 1]} : vector<4x8x16xf32> to vector<4x8x8xf32>
    %9 = vector.shape_cast %8 : vector<4x8x8xf32> to vector<4x1x8x8xf32>
    %c0_8 = arith.constant 0 : index
    %c1 = arith.constant 1 : index
    %c0_9 = arith.constant 0 : index
    %c0_10 = arith.constant 0 : index
    %10 = vector.load %arg4[%c0_8, %c1, %c0_9, %c0_10] : memref<4x4x8x8xf32, #tpu.memory_space<vmem>>, vector<4x1x8x8xf32>
    tpu.vector_store %arg4[%c0_8, %c1, %c0_9, %c0_10], %9 {strides = array<i32>} : memref<4x4x8x8xf32, #tpu.memory_space<vmem>>, vector<4x1x8x8xf32>,
    %c0_11 = arith.constant 0 : index
    %c0_12 = arith.constant 0 : index
    %c16 = arith.constant 16 : index
    %11 = vector.load %arg2[%c0_11, %c0_12, %c16] : memref<4x8x32xf32, #tpu.memory_space<vmem>>, vector<4x8x16xf32>
    %12 = vector.shape_cast %11 : vector<4x8x16xf32> to vector<32x16xf32>
    %cst_13 = arith.constant dense<0.000000e+00> : vector<32x16xf32>
    %13 = tpu.matmul %12, %0, %cst_13 {dimension_numbers = #tpu.dot_dimension_numbers<[1], [0], [0], [1], [0, 0, 1, 1], [], []>} : vector<32x16xf32>, vector<16x16xf32>, vector<32x16xf32> -> vector<32x16xf32>
    %14 = vector.shape_cast %13 : vector<32x16xf32> to vector<4x8x16xf32>
    %15 = vector.extract_strided_slice %14 {offsets = [0, 0, 0], sizes = [4, 8, 8], strides = [1, 1, 1]} : vector<4x8x16xf32> to vector<4x8x8xf32>
    %16 = vector.shape_cast %15 : vector<4x8x8xf32> to vector<4x1x8x8xf32>
    %c0_14 = arith.constant 0 : index
    %c2 = arith.constant 2 : index
    %c0_15 = arith.constant 0 : index
    %c0_16 = arith.constant 0 : index
    %17 = vector.load %arg4[%c0_14, %c2, %c0_15, %c0_16] : memref<4x4x8x8xf32, #tpu.memory_space<vmem>>, vector<4x1x8x8xf32>
    tpu.vector_store %arg4[%c0_14, %c2, %c0_15, %c0_16], %16 {strides = array<i32>} : memref<4x4x8x8xf32, #tpu.memory_space<vmem>>, vector<4x1x8x8xf32>,
    %18 = vector.extract_strided_slice %14 {offsets = [0, 0, 8], sizes = [4, 8, 8], strides = [1, 1, 1]} : vector<4x8x16xf32> to vector<4x8x8xf32>
    %19 = vector.shape_cast %18 : vector<4x8x8xf32> to vector<4x1x8x8xf32>
    %c0_17 = arith.constant 0 : index
    %c3 = arith.constant 3 : index
    %c0_18 = arith.constant 0 : index
    %c0_19 = arith.constant 0 : index
    %20 = vector.load %arg4[%c0_17, %c3, %c0_18, %c0_19] : memref<4x4x8x8xf32, #tpu.memory_space<vmem>>, vector<4x1x8x8xf32>
    tpu.vector_store %arg4[%c0_17, %c3, %c0_18, %c0_19], %19 {strides = array<i32>} : memref<4x4x8x8xf32, #tpu.memory_space<vmem>>, vector<4x1x8x8xf32>,
    return
  }
  func.func @transform_0(%arg0: i32, %arg1: i32) -> (i32, i32, i32) {
    %c0_i32 = arith.constant 0 : i32
    %c0_i32_0 = arith.constant 0 : i32
    return %arg0, %arg1, %c0_i32 : i32, i32, i32
  }
  func.func @transform_1(%arg0: i32, %arg1: i32) -> (i32, i32) {
    %c0_i32 = arith.constant 0 : i32
    %c0_i32_0 = arith.constant 0 : i32
    %c0_i32_1 = arith.constant 0 : i32
    return %c0_i32, %c0_i32_0 : i32, i32
  }
  func.func @transform_2(%arg0: i32, %arg1: i32) -> (i32, i32, i32, i32) {
    %c0_i32 = arith.constant 0 : i32
    %c0_i32_0 = arith.constant 0 : i32
    %c0_i32_1 = arith.constant 0 : i32
    return %arg0, %c0_i32, %arg1, %c0_i32_0 : i32, i32, i32, i32
  }
}

</mosaic_0001>

<bundles_post_ra>
// kernel: tpu_custom_call.1
= control target key start
LH: loop header
LB: loop body
LE: loop exit
PB: predicated region body
PF: predicated region fallthrough
CT: control target
= control target key end

     0   :  { %7 = vsyncpa [#allocation3], 0  ;;  %s959_s0 = inlined_call_operand.hbm [shape: f32[8,8,32], index: 0, kind: input, shape index: {}]   ;;  %s960_s1 = inlined_call_operand.hbm [shape: f32[16,16], index: 1, kind: input, shape index: {}]   ;;  %s961_s2 = inlined_call_operand.hbm [shape: f32[8,4,8,8], index: 2, kind: output, shape index: {}]  }
   0x1   :  { %9 = vsyncpa [#allocation3 + $0x1], 0 }
   0x2   :  { %10 = vsyncpa [#allocation6], 0 }
   0x3   :  { %11 = vsyncpa [#allocation4], 0 }
   0x4   :  { %13 = vsyncpa [#allocation4 + $0x1], 0  ;;  %s760_s9 = smov 0   ;;  %s762_s10 = smov 0  }
   0x5   :  { %s764_s11 = smov 0   ;;  %s766_s12 = smov 0  }
   0x6   :  { %s768_s13 = smov 0   ;;  %s770_s14 = smov 0  }
   0x7 LB: > { %s466_s15 = sadd.s32 4294967295, %s736_s14   ;;  %s467_s16 = sadd.s32 4294967294, %s736_s14   ;;  %s736_s14 = sphi %s770_s14, %s19_s14   ;;  %s732_s13 = sphi %s768_s13, %s973_s13   ;;  %s728_s12 = sphi %s766_s12, %s972_s12   ;;  %s724_s11 = sphi %s764_s11, %s971_s11   ;;  %s720_s10 = sphi %s762_s10, %s970_s10   ;;  %s716_s9 = sphi %s760_s9, %s969_s9  }
   0x8   : > { %p53_p0 = scmp.ne.s32.totalorder %s720_s10, %s716_s9  ;;  %p794_p1 = scmp.eq.s32.totalorder %s466_s15, 0 }
   0x9   : > { %p798_p2 = scmp.eq.s32.totalorder %s466_s15, 1  ;;  %p106_p3 = scmp.eq.s32.totalorder %s467_s16, 1 }
   0xa   : > { %p804_p4 = por %p794_p1, %p53_p0  ;;  %p468_p5 = scmp.ge.s32.totalorder %s736_s14, 1 }
   0xb   : > { %p809_p6 = por %p106_p3, %p53_p0  ;;  %p113_p7 = scmp.lt.s32.totalorder %s736_s14, 3 }
   0xc   : > { %s124_s23 = sshll.u32 %s960_s1, 4  ;;  %s738_s25 = smov [#allocation5]   ;;  %s125_s23 = int_to_ptr.hbm [resolvable:$true] %s124_s23 }
   0xd   : > { %p817_p8 = pnand %p468_p5, %p113_p7  ;;  %s126_s26 = sshll.u32 %s738_s25, 4  ;;  %s127_s26 = int_to_ptr.vmem [resolvable:$true] %s126_s26 }
   0xe   : > { %p470_p11 = scmp.ge.s32.totalorder %s736_s14, 2  ;;  %s739_s27 = smov 128  }
   0xf   : > { %p519_p9 = pneg %p817_p8  ;;  %s740_s28 = smov 8  }
  0x10   : > { %s31_s29 = sadd.s32 1, %s732_s13  ;;  %s40_s30 = sadd.s32 1, %s724_s11 }
  0x11   : > { %p520_p10 = pnand %p519_p9, %p794_p1  ;;  %p33_p12 = scmp.ge.s32.totalorder %s31_s29, 2 }
  0x12   : > { %p47_p13 = scmp.ne.s32.totalorder %s724_s11, %s720_s10  ;;  %p48_p0 = scmp.eq.s32.totalorder %s736_s14, 0 }
  0x13   : > { %522 = dma.hbm_to_vmem [thread:$0]  (!%p520_p10), %s125_s23, 256, %s127_s26, [#allocation6], %s739_s27, %s739_s27, %s740_s28  }
  0x14   : > { %s975_s29 = smov (%p33_p12, %s31_s29), 0  ;;  %p836_p3 = por %p48_p0, %p47_p13 }
  0x15   : > { %p842_p5 = por %p798_p2, %p47_p13  ;;  %s35_s5 = ssub.s32 %s732_s13, %s975_s29 }
  0x16   : > { %p532_p7 = scmp.lt.s32.totalorder %s736_s14, 2  ;;  %p38_p9 = scmp.eq.s32.totalorder %s35_s5, 0 }
  0x17   : > { %s140_s6 = sand.u32 1, %s724_s11   ;;  %s504_s15 = sshll.u32 %s732_s13, 5 }
  0x18   : > { %s471_s7 = sshll.u32 %s140_s6, 5  ;;  %s150_s22 = scalar_lea.hbm %s959_s0, %s504_s15 }
  0x19   : > { %s851_s8 = scalar_select %p38_p9, %s724_s11, %s40_s30  }
  0x1a   : > { %s144_s23 = scalar_lea.vmem [#allocation2], %s471_s7  ;;  %s151_s18 = sshll.u32 %s150_s22, 4  ;;  %s152_s18 = int_to_ptr.hbm [resolvable:$true] %s151_s18 }
  0x1b   : > { %s153_s25 = sshll.u32 %s144_s23, 4  ;;  %p524_p2 = pnand %p532_p7, %p836_p3  ;;  %s154_s25 = int_to_ptr.vmem [resolvable:$true] %s153_s25 }
  0x1c   : > { %s141_s26 = scalar_lea.sflag [#allocation3], %s140_s6  ;;  %165 = sbr.rel (%p817_p8) target bundleno = 413 (0x19d), region = 28 }
  0x1d   : > { %526 = dma.hbm_to_vmem [thread:$0]  (!%p524_p2), %s152_s18, 512, %s154_s25, %s141_s26, %s739_s27, %s739_s27, %s740_s28  }
  0x1e   : > { %s865_s30 = sand.u32 (!%p817_p8), 1, %s720_s10  }
  0x1f   : > { %s475_s5 = sshll.u32 (!%p817_p8), %s865_s30, 5  ;;  %s168_s7 = scalar_lea.sflag (!%p817_p8), [#allocation3], %s865_s30 }
  0x20   : > { %s171_s15 = scalar_lea.vmem (!%p817_p8), [#allocation2], %s475_s5 }
  0x21   : > { %703 = dma.done.wait (%p804_p4), %s168_s7, 512  }
  0x22   : > { %705 = vsyncadd (%p804_p4), %s168_s7, 4294966784 }
  0x23   : > { %707 = dma.done.wait (%p794_p1), [#allocation6], 256  }
  0x24   : > { %709 = vsyncadd (%p794_p1), [#allocation6], 4294967040  ;;  %v276_v0 = vld [vmem:[%s171_s15 + $0x10] sm:$0xff]  ;;  %v277_v1 = vld [vmem:[%s171_s15 + $0x18] sm:$0xff]  ;;  %s741_s24 = smov 112   ;;  %vm206_vm0 = vcmask 130048  }
  0x25   : > { %286 = vrot.lane.b32.xlu0 %v276_v0, %s741_s24  ;;  %288 = vrot.lane.b32.xlu1 %v277_v1, %s741_s24  ;;  %v201_v2 = vld [vmem:[#allocation5 + $0x8] sm:$0xff]  ;;  %v200_v3 = vld [vmem:[#allocation5] sm:$0xff]  ;;  %s477_s17 = sshll.u32 %s865_s30, 7  ;;  %vm248_vm1 = vcmask 64512   ;;  %s742_s27 = smov 120  }
  0x26   : > { %507 = vmatpush.msra.mxu2 %v201_v2  ;;  %233 = vmatpush.msra.mxu0 %v201_v2  ;;  %v274_v4 = vld [vmem:[%s171_s15] sm:$0xff]  ;;  %v275_v5 = vld [vmem:[%s171_s15 + $0x8] sm:$0xff]  ;;  %s885_s19 = scalar_lea.vmem [#allocation7], %s477_s17  ;;  %s506_s28 = sshll.u32 %s728_s12, 7 }
  0x27   : > { %509 = vmatpush.msra.mxu3 %v201_v2  ;;  %312 = vmatpush.msra.mxu1 %v201_v2  ;;  %s367_s16 = scalar_lea.hbm %s961_s2, %s506_s28  ;;  %s368_s21 = sshll.u32 %s885_s19, 4  ;;  %s369_s21 = int_to_ptr.vmem [resolvable:$true] %s368_s21 }
  0x28   : > { %508 = vmatpush.msra.mxu2 %v200_v3  ;;  %234 = vmatpush.msra.mxu0 %v200_v3  ;;  %s370_s22 = sshll.u32 %s367_s16, 4  ;;  %s354_s23 = scalar_lea.sflag [#allocation4], %s865_s30  ;;  %s371_s22 = int_to_ptr.hbm [resolvable:$true] %s370_s22 }
  0x29   : > { %480 = vmatmul.msk.f32.vlgmr.msra.gmra.mxu2 %vm206_vm0, %v276_v0  ;;  %478 = vmatmul.msk.f32.vlgmr.msra.gmra.mxu0 %vm206_vm0, %v274_v4  ;;  %s664_s25 = sshra.s32 %s371_s22, 4  ;;  %s670_s5 = scalar_lea.hbm %s961_s2, 256  ;;  %s665_s25 = int_to_ptr.hbm [resolvable:$true] %s664_s25 }
  0x2a   : > { %510 = vmatpush.msra.mxu3 %v200_v3  ;;  %313 = vmatpush.msra.mxu1 %v200_v3  ;;  %s666_s18 = scalar_lea.hbm %s665_s25, 128  ;;  %p671_p10 = scmp.lt.s32.totalorder %s665_s25, %s961_s2 }
  0x2b   : > { %p667_p1 = scmp.ne.s32.totalorder %s665_s25, %s666_s18  ;;  %p672_p12 = scmp.lt.s32.totalorder %s670_s5, %s666_s18 }
  0x2d   : > { %282 = vrot.lane.b32.xlu0 %v274_v4, %s741_s24  ;;  %284 = vrot.lane.b32.xlu1 %v275_v5, %s741_s24  ;;  %p668_p4 = pnand %p667_p1, %p842_p5  ;;  %p673_p13 = por %p672_p12, %p671_p10 }
  0x2f   : > { %p669_p8 = pneg %p668_p4 }
  0x31   : > { %481 = vmatmul.msk.f32.gmra.mxu2 %vm206_vm0, %v277_v1  ;;  %479 = vmatmul.msk.f32.gmra.mxu0 %vm206_vm0, %v275_v5  ;;  %p674_p0 = pnand %p673_p13, %p669_p8 }
  0x97   : > { %v287_v6 = vpop.permute.xlu0 %286  ;;  %v289_v7 = vpop.permute.xlu1 %288 }
  0x98   : > { %488 = vmatmul.msk.f32.vlgmr.msra.gmra.mxu3 %vm206_vm0, %v287_v6 }
  0x9f   : > { %v283_v8 = vpop.permute.xlu0 %282  ;;  %v285_v9 = vpop.permute.xlu1 %284 }
  0xa0   : > { %486 = vmatmul.msk.f32.vlgmr.msra.gmra.mxu1 %vm206_vm0, %v283_v8  ;;  %489 = vmatmul.msk.f32.gmra.mxu3 %vm206_vm0, %v289_v7 }
  0xa6   : > { %v236_v10 = vpop.f32.mrf.mxu0 }
  0xa7   : > { %249 = vst.msk [vmem:[%s885_s19] sm:$0xff] %vm248_vm1, %v236_v10  ;;  %257 = vrot.lane.b32.xlu2 %v236_v10, %s742_s27 }
  0xa8   : > { %487 = vmatmul.msk.f32.gmra.mxu1 %vm206_vm0, %v285_v9 }
  0xac   : > { %v242_v11 = vpop.f32.mrf.mxu2 }
  0xad   : > { %251 = vst.msk [vmem:[%s885_s19 + $0x40] sm:$0xff] %vm248_vm1, %v242_v11  ;;  %261 = vrot.lane.b32.xlu0 %v242_v11, %s742_s27 }
  0xae   : > { %v239_v12 = vpop.f32.mrf.mxu0 }
  0xaf   : > { %250 = vst.msk [vmem:[%s885_s19 + $0x20] sm:$0xff] %vm248_vm1, %v239_v12  ;;  %259 = vrot.lane.b32.xlu2 %v239_v12, %s742_s27 }
  0xb4   : > { %v245_v13 = vpop.f32.mrf.mxu2 }
  0xb5   : > { %252 = vst.msk [vmem:[%s885_s19 + $0x60] sm:$0xff] %vm248_vm1, %v245_v13  ;;  %263 = vrot.lane.b32.xlu1 %v245_v13, %s742_s27 }
 0x101   : > { %v258_v14 = vpop.permute.xlu2 %257 }
 0x102   : > { %482 = vst.msk [vmem:[%s885_s19 + $0x8] sm:$0xff] %vm248_vm1, %v258_v14 }
 0x109   : > { %v260_v15 = vpop.permute.xlu2 %259 }
 0x10a   : > { %483 = vst.msk [vmem:[%s885_s19 + $0x28] sm:$0xff] %vm248_vm1, %v260_v15 }
 0x11b   : > { %v321_v16 = vpop.f32.mrf.mxu3 }
 0x11c   : > { %492 = vst.msk [vmem:[%s885_s19 + $0x50] sm:$0xff] %vm248_vm1, %v321_v16  ;;  %340 = vrot.lane.b32.xlu1 %v321_v16, %s742_s27 }
 0x11d   : > { %v315_v17 = vpop.f32.mrf.mxu1 }
 0x11e   : > { %490 = vst.msk [vmem:[%s885_s19 + $0x10] sm:$0xff] %vm248_vm1, %v315_v17  ;;  %336 = vrot.lane.b32.xlu2 %v315_v17, %s742_s27 }
 0x11f   : > { %v262_v21 = vpop.permute.xlu0 %261 }
 0x120   : > { %484 = vst.msk [vmem:[%s885_s19 + $0x48] sm:$0xff] %vm248_vm1, %v262_v21 }
 0x123   : > { %v324_v18 = vpop.f32.mrf.mxu3 }
 0x124   : > { %493 = vst.msk [vmem:[%s885_s19 + $0x70] sm:$0xff] %vm248_vm1, %v324_v18 }
 0x125   : > { %v318_v19 = vpop.f32.mrf.mxu1 }
 0x126   : > { %491 = vst.msk [vmem:[%s885_s19 + $0x30] sm:$0xff] %vm248_vm1, %v318_v19  ;;  %338 = vrot.lane.b32.xlu0 %v318_v19, %s742_s27  ;;  %342 = vrot.lane.b32.xlu2 %v324_v18, %s742_s27 }
 0x127   : > { %v264_v20 = vpop.permute.xlu1 %263 }
 0x128   : > { %485 = vst.msk [vmem:[%s885_s19 + $0x68] sm:$0xff] %vm248_vm1, %v264_v20 }
 0x178   : > { %v337_v22 = vpop.permute.xlu2 %336 }
 0x179   : > { %494 = vst.msk [vmem:[%s885_s19 + $0x18] sm:$0xff] %vm248_vm1, %v337_v22 }
 0x180   : > { %v343_v23 = vpop.permute.xlu2 %342 }
 0x181   : > { %497 = vst.msk [vmem:[%s885_s19 + $0x78] sm:$0xff] %vm248_vm1, %v343_v23 }
 0x18e   : > { %v341_v24 = vpop.permute.xlu1 %340 }
 0x18f   : > { %496 = vst.msk [vmem:[%s885_s19 + $0x58] sm:$0xff] %vm248_vm1, %v341_v24 }
 0x198   : > { %v339_v25 = vpop.permute.xlu0 %338 }
 0x199   : > { %495 = vst.msk [vmem:[%s885_s19 + $0x38] sm:$0xff] %vm248_vm1, %v339_v25 }
 0x19a   : > { %677 = shalt.err (!%p674_p0)
}
 0x19b   : > { %s743_s30 = smov 128   ;;  %s744_s24 = smov 8  }
 0x19c   : > { %517 = dma.vmem_to_hbm [thread:$0]  (%p842_p5), %s369_s21, 2048, %s371_s22, %s354_s23, %s743_s30, %s743_s30, %s744_s24  }
 0x19d PF: > { %s385_s17 = sand.u32 1, %s716_s9   ;;  %p528_p3 = pnand %p470_p11, %p809_p6 }
 0x19e   : > { %s386_s19 = scalar_lea.sflag [#allocation4], %s385_s17 }
 0x19f   : > { %p529_p7 = pneg %p528_p3 }
 0x1a1   : > { %711 = dma.done.wait (%p529_p7), %s386_s19, 2048  }
 0x1a2   : > { %713 = vsyncadd (%p529_p7), %s386_s19, 4294965248  ;;  %s19_s14 = sadd.s32 1, %s736_s14   ;;  %s969_s9 = smov %s720_s10 }
 0x1a3   : > { %p16_p9 = scmp.ge.s32.totalorder %s19_s14, 4   ;;  %s970_s10 = smov %s724_s11 }
 0x1a4   : > { %s971_s11 = smov %s851_s8  ;;  %s972_s12 = smov %s732_s13 }
 0x1a5   : > { %s973_s13 = smov %s975_s29  ;;  %18 = sbr.rel (!%p16_p9) target bundleno = 7 (0x7), region = 80 }
 0x1aa   :  { %392 = vsyncpa [#allocation3], 1 }
 0x1ab   :  { %394 = vsyncpa [#allocation3 + $0x1], 1 }
 0x1ac   :  { %395 = vsyncpa [#allocation6], 1 }
 0x1ad   :  { %396 = vsyncpa [#allocation4], 1 }
 0x1ae   :  { %398 = vsyncpa [#allocation4 + $0x1], 1 }

</bundles_post_ra>
